<compile_context>
chip_gen: v7x
topology: tpu7x:2x2x1
jax: 0.10.0
libtpu: 0.0.40
codegen_flags: <defaults>
</compile_context>

<pallas_src>
import functools

import numpy as np
import jax
import jax.numpy as jnp
from jax.experimental import pallas as pl
from jax.experimental.pallas import tpu as pltpu

# -------------------- model hyperparameters (TimeAggNet defaults) -----------------
BS = 2
N_NODES = 4
T = 1200            # smallest T for which the conv/pool chain ends with length 1
IREP = [1, 1, 1]    # internal_rep=None default -> [1, 1, 1]
NCLASS = 3

K1, S1, P1 = 10, 8, 1          # Conv1d(1->1, k=10, s=8, p=1)
KP1, SP1 = 5, 5                # MaxPool1d(k=5, s=5, p=0)
K2, S2 = 3, 3                  # Conv1d(1->1, k=3, s=3, p=0)
KP2, SP2, PP2 = 3, 3, 1        # MaxPool1d(k=3, s=3, p=1)
K3 = 4                         # Conv1d(1->1, k=4, s=1, p=0)

LANE = 128


def chain_lengths(t):
    l1 = (t + 2 * P1 - K1) // S1 + 1
    l2 = (l1 - KP1) // SP1 + 1
    l3 = (l2 - K2) // S2 + 1
    l4 = (l3 + 2 * PP2 - KP2) // SP2 + 1
    l5 = l4 - K3 + 1
    return l1, l2, l3, l4, l5


# ------------------------------- Pallas kernel --------------------------------------
def timeagg_kernel(xim_ref, cst_ref, sc_ref, out_ref, scr_ref, *,
                   bs, n_nodes, r, l2p, wcr_row):
    f32 = jnp.float32

    # hoist all SMEM scalar reads (10 conv1 taps + 2 biases)
    w1s = [sc_ref[0, j] for j in range(K1)]
    b1 = sc_ref[0, K1]
    b3 = sc_ref[0, K1 + 1]

    # conv1 (10 VPU FMAs per pool tap) + ReLU, then pool1 as a max over the 5
    # pool taps (each tap lives in its own slab -> no lane shuffles, no MXU).
    h2 = None
    for k in range(KP1):
        base = k * K1
        h1 = xim_ref[base] * w1s[0]
        for j in range(1, K1):
            h1 = h1 + xim_ref[base + j] * w1s[j]
        h1 = jnp.maximum(h1 + b1, 0.0)                       # (r, l2p)
        h2 = h1 if h2 is None else jnp.maximum(h2, h1)       # (r, l2p), >= 0

    # conv2 + bias + ReLU with the pool2 taps spread to 128-lane-aligned slabs:
    # one small MXU matmul; pad/invalid columns get a 0 bias so they stay 0.
    h3w = jnp.dot(h2, cst_ref[0:l2p, :], preferred_element_type=f32)
    h3w = jnp.maximum(h3w + cst_ref[l2p:l2p + 1, :], 0.0)    # (r, KP2*128)

    # pool2: elementwise max of whole-vreg slabs (zero pad == -inf pad post-ReLU)
    h4 = h3w[:, 0:LANE]
    for kk in range(1, KP2):
        h4 = jnp.maximum(h4, h3w[:, kk * LANE:(kk + 1) * LANE])   # (r, 128)

    # conv3 (k=4 -> temporal length 1): masked lane reduce on the XLU + ReLU
    w3lane = cst_ref[l2p + 1:l2p + 2, 0:LANE]                # (1, 128)
    h5 = jnp.sum(h4 * w3lane, axis=1, keepdims=True) + b3
    h5 = jnp.maximum(h5, 0.0)                                # (r, 1)

    # classifier (Linear n_nodes -> 3) + softmax, fully MXU-free:
    # per-row class contributions go to a tiny VMEM scratch, then each batch's
    # node rows are summed with cheap sublane row reads.
    wcr = cst_ref[wcr_row:wcr_row + r, 0:NCLASS]             # (r, 3)
    bc = cst_ref[l2p + 2:l2p + 3, 0:NCLASS]                  # (1, 3)
    scr_ref[...] = h5 * wcr
    for b in range(bs):
        row0 = b * n_nodes
        acc = scr_ref[row0:row0 + 1, :]
        for n in range(1, n_nodes):
            acc = acc + scr_ref[row0 + n:row0 + n + 1, :]
        logits = acc + bc                                    # (1, 3)
        m = jnp.max(logits, axis=1, keepdims=True)
        e = jnp.exp(logits - m)
        s = jnp.sum(e, axis=1, keepdims=True)
        out_ref[b:b + 1, :] = e * pl.reciprocal(s, approx=True)


# ------------------------------- wrapper ---------------------------------------------
@jax.jit
def time_agg_net_forward(x, w1, b1, w2, b2, w3, b3, wc, bc):
    bs, n_nodes, t = x.shape
    r = bs * n_nodes
    l1, l2, l3, l4, l5 = chain_lengths(t)
    assert l5 == 1, "classifier view() requires the final temporal length to be 1"
    assert l4 <= LANE
    l2p = ((l2 + 7) // 8) * 8                 # conv2 contraction dim, padded
    wcr_row = ((l2p + 3 + 7) // 8) * 8        # 8-aligned row offset of wcr block
    nw = KP2 * LANE                           # width of the packed constant block

    x2 = x.reshape(r, t).astype(jnp.float32)
    xp = jnp.pad(x2, ((0, 0), (P1, P1)))      # zero-pad for conv1

    # conv1 im2col grouped by (pool1 tap k, conv1 tap j): lane axis = pool1 output
    # position.  idx[j, k, o2] = (SP1*o2 + k)*S1 + j  (already shifted by pad P1).
    o2 = np.arange(l2)
    kk1 = np.arange(KP1)
    jj1 = np.arange(K1)
    idx = (SP1 * o2[None, None, :] + kk1[None, :, None]) * S1 + jj1[:, None, None]
    xg = xp[:, idx]                                          # (r, K1, KP1, l2)
    xim = jnp.transpose(xg, (2, 1, 0, 3))                    # (KP1, K1, r, l2)
    xim = jnp.pad(xim, ((0, 0), (0, 0), (0, 0), (0, l2p - l2)))
    xim = xim.reshape(KP1 * K1, r, l2p)                      # (50, r, l2p)

    # static 0/1 masks for the fused conv2 + pool2-tap-spread matrix (trace-time)
    m2 = np.zeros((K2, l2p, nw), np.float32)
    b2m = np.zeros((1, nw), np.float32)
    for kk in range(KP2):                     # pool2 tap
        for q in range(l4):                   # pool2 output position
            o = SP2 * q + kk - PP2            # conv2 output position feeding it
            if 0 <= o < l3:
                col = kk * LANE + q
                b2m[0, col] = 1.0
                for jj in range(K2):          # conv2 tap
                    m2[jj, S2 * o + jj, col] = 1.0

    w2f = jnp.asarray(w2, jnp.float32).reshape(K2)
    a3 = jnp.tensordot(w2f, jnp.asarray(m2), axes=1)         # (l2p, nw)
    b2row = jnp.asarray(b2, jnp.float32).reshape(1, 1) * jnp.asarray(b2m)

    w3f = jnp.asarray(w3, jnp.float32).reshape(K3)
    w3lane = jnp.zeros((1, nw), jnp.float32).at[0, :K3].set(w3f)

    wcr = jnp.tile(jnp.asarray(wc, jnp.float32).T, (bs, 1))  # (r, 3)
    wcr_pad = jnp.pad(wcr, ((0, 0), (0, nw - NCLASS)))
    bc_pad = jnp.pad(jnp.asarray(bc, jnp.float32).reshape(1, NCLASS),
                     ((0, 0), (0, nw - NCLASS)))
    gap = jnp.zeros((wcr_row - (l2p + 3), nw), jnp.float32)

    # one packed constant block: [A3 | b2row | w3lane | bc | pad | wcr]
    cst = jnp.concatenate([a3, b2row, w3lane, bc_pad, gap, wcr_pad], axis=0)

    # SMEM scalars: 10 conv1 taps, b1, b3
    sc = jnp.concatenate([jnp.asarray(w1, jnp.float32).reshape(K1),
                          jnp.asarray(b1, jnp.float32).reshape(1),
                          jnp.asarray(b3, jnp.float32).reshape(1)]).reshape(1, K1 + 2)

    kern = functools.partial(timeagg_kernel, bs=bs, n_nodes=n_nodes, r=r,
                             l2p=l2p, wcr_row=wcr_row)
    vmem = pl.BlockSpec(memory_space=pltpu.MemorySpace.VMEM)
    smem = pl.BlockSpec(memory_space=pltpu.MemorySpace.SMEM)

    return pl.pallas_call(
        kern,
        out_shape=jax.ShapeDtypeStruct((bs, NCLASS), jnp.float32),
        in_specs=[vmem,    # xim  (50, r, l2p)
                  vmem,    # cst  (wcr_row + r, 384)
                  smem],   # sc   (1, 12)
        out_specs=vmem,
        scratch_shapes=[pltpu.VMEM((r, NCLASS), jnp.float32)],
    )(xim, cst, sc)


# ------------------------------- pure-JAX reference -----------------------------------
def ref_forward(x, w1, b1, w2, b2, w3, b3, wc, bc):
    bs, n, t = x.shape
    y = x.reshape(bs * n, 1, t)

    def conv1d(inp, w, b, stride, pad):
        out = jax.lax.conv_general_dilated(
            inp, w, window_strides=(stride,), padding=[(pad, pad)],
            dimension_numbers=('NCH', 'OIH', 'NCH'))
        return out + b.reshape(1, -1, 1)

    def maxpool1d(inp, k, stride, pad):
        return jax.lax.reduce_window(
            inp, -jnp.inf, jax.lax.max,
            (1, 1, k), (1, 1, stride), [(0, 0), (0, 0), (pad, pad)])

    h = jax.nn.relu(conv1d(y, w1, b1, 8, 1))
    h = jax.nn.relu(maxpool1d(h, 5, 5, 0))
    h = jax.nn.relu(conv1d(h, w2, b2, 3, 0))
    h = jax.nn.relu(maxpool1d(h, 3, 3, 1))
    h = jax.nn.relu(conv1d(h, w3, b3, 1, 0))      # (bs*n, 1, 1)
    feat = h.reshape(bs, n * IREP[2])
    logits = feat @ wc.T + bc
    return jax.nn.softmax(logits, axis=1)


# ------------------------------- main ---------------------------------------------------
if __name__ == "__main__":
    key = jax.random.PRNGKey(0)
    ks = jax.random.split(key, 9)
    x = jax.random.normal(ks[0], (BS, N_NODES, T), jnp.float32)

    # deterministic synthetic parameters (shapes from TimeAggNet.__init__)
    w1 = jax.random.normal(ks[1], (IREP[0], 1, 10), jnp.float32) * 0.3
    b1 = jax.random.normal(ks[2], (IREP[0],), jnp.float32) * 0.1
    w2 = jax.random.normal(ks[3], (IREP[1], IREP[0], 3), jnp.float32) * 0.3
    b2 = jax.random.normal(ks[4], (IREP[1],), jnp.float32) * 0.1
    w3 = jax.random.normal(ks[5], (IREP[2], IREP[1], 4), jnp.float32) * 0.3
    b3 = jax.random.normal(ks[6], (IREP[2],), jnp.float32) * 0.1
    wc = jax.random.normal(ks[7], (NCLASS, N_NODES * IREP[2]), jnp.float32) * 0.3
    bc = jax.random.normal(ks[8], (NCLASS,), jnp.float32) * 0.1

    out = time_agg_net_forward(x, w1, b1, w2, b2, w3, b3, wc, bc)
    out = jax.block_until_ready(out)

    ref = jax.block_until_ready(ref_forward(x, w1, b1, w2, b2, w3, b3, wc, bc))
    np.testing.assert_allclose(np.asarray(out), np.asarray(ref), rtol=2e-3, atol=2e-3)

    print("KERNEL_OK")
</pallas_src>

<mosaic_0001>
module attributes {stable_mosaic.version = 11 : i64} {
  func.func @timeagg_kernel(%arg0: memref<50x8x32xf32, #tpu.memory_space<vmem>>, %arg1: memref<48x384xf32, #tpu.memory_space<vmem>>, %arg2: memref<1x12xf32, #tpu.memory_space<smem>>, %arg3: memref<2x3xf32, #tpu.memory_space<vmem>>, %arg4: memref<8x3xf32, #tpu.memory_space<vmem>>) attributes {dimension_semantics = [], scalar_prefetch = 0 : i64, scratch_operands = 1 : i64, tpu.core_type = #tpu.core_type<tc>} {
    %c0 = arith.constant 0 : index
    %c0_0 = arith.constant 0 : index
    %0 = memref.load %arg2[%c0, %c0_0] : memref<1x12xf32, #tpu.memory_space<smem>>
    %c0_1 = arith.constant 0 : index
    %c1 = arith.constant 1 : index
    %1 = memref.load %arg2[%c0_1, %c1] : memref<1x12xf32, #tpu.memory_space<smem>>
    %c0_2 = arith.constant 0 : index
    %c2 = arith.constant 2 : index
    %2 = memref.load %arg2[%c0_2, %c2] : memref<1x12xf32, #tpu.memory_space<smem>>
    %c0_3 = arith.constant 0 : index
    %c3 = arith.constant 3 : index
    %3 = memref.load %arg2[%c0_3, %c3] : memref<1x12xf32, #tpu.memory_space<smem>>
    %c0_4 = arith.constant 0 : index
    %c4 = arith.constant 4 : index
    %4 = memref.load %arg2[%c0_4, %c4] : memref<1x12xf32, #tpu.memory_space<smem>>
    %c0_5 = arith.constant 0 : index
    %c5 = arith.constant 5 : index
    %5 = memref.load %arg2[%c0_5, %c5] : memref<1x12xf32, #tpu.memory_space<smem>>
    %c0_6 = arith.constant 0 : index
    %c6 = arith.constant 6 : index
    %6 = memref.load %arg2[%c0_6, %c6] : memref<1x12xf32, #tpu.memory_space<smem>>
    %c0_7 = arith.constant 0 : index
    %c7 = arith.constant 7 : index
    %7 = memref.load %arg2[%c0_7, %c7] : memref<1x12xf32, #tpu.memory_space<smem>>
    %c0_8 = arith.constant 0 : index
    %c8 = arith.constant 8 : index
    %8 = memref.load %arg2[%c0_8, %c8] : memref<1x12xf32, #tpu.memory_space<smem>>
    %c0_9 = arith.constant 0 : index
    %c9 = arith.constant 9 : index
    %9 = memref.load %arg2[%c0_9, %c9] : memref<1x12xf32, #tpu.memory_space<smem>>
    %c0_10 = arith.constant 0 : index
    %c10 = arith.constant 10 : index
    %10 = memref.load %arg2[%c0_10, %c10] : memref<1x12xf32, #tpu.memory_space<smem>>
    %c0_11 = arith.constant 0 : index
    %c11 = arith.constant 11 : index
    %11 = memref.load %arg2[%c0_11, %c11] : memref<1x12xf32, #tpu.memory_space<smem>>
    %c0_12 = arith.constant 0 : index
    %c0_13 = arith.constant 0 : index
    %c0_14 = arith.constant 0 : index
    %12 = vector.load %arg0[%c0_12, %c0_13, %c0_14] : memref<50x8x32xf32, #tpu.memory_space<vmem>>, vector<1x8x32xf32>
    %13 = vector.shape_cast %12 : vector<1x8x32xf32> to vector<8x32xf32>
    %14 = vector.broadcast %0 : f32 to vector<8x32xf32>
    %15 = arith.mulf %13, %14 : vector<8x32xf32>
    %c1_15 = arith.constant 1 : index
    %c0_16 = arith.constant 0 : index
    %c0_17 = arith.constant 0 : index
    %16 = vector.load %arg0[%c1_15, %c0_16, %c0_17] : memref<50x8x32xf32, #tpu.memory_space<vmem>>, vector<1x8x32xf32>
    %17 = vector.shape_cast %16 : vector<1x8x32xf32> to vector<8x32xf32>
    %18 = vector.broadcast %1 : f32 to vector<8x32xf32>
    %19 = arith.mulf %17, %18 : vector<8x32xf32>
    %20 = arith.addf %15, %19 : vector<8x32xf32>
    %c2_18 = arith.constant 2 : index
    %c0_19 = arith.constant 0 : index
    %c0_20 = arith.constant 0 : index
    %21 = vector.load %arg0[%c2_18, %c0_19, %c0_20] : memref<50x8x32xf32, #tpu.memory_space<vmem>>, vector<1x8x32xf32>
    %22 = vector.shape_cast %21 : vector<1x8x32xf32> to vector<8x32xf32>
    %23 = vector.broadcast %2 : f32 to vector<8x32xf32>
    %24 = arith.mulf %22, %23 : vector<8x32xf32>
    %25 = arith.addf %20, %24 : vector<8x32xf32>
    %c3_21 = arith.constant 3 : index
    %c0_22 = arith.constant 0 : index
    %c0_23 = arith.constant 0 : index
    %26 = vector.load %arg0[%c3_21, %c0_22, %c0_23] : memref<50x8x32xf32, #tpu.memory_space<vmem>>, vector<1x8x32xf32>
    %27 = vector.shape_cast %26 : vector<1x8x32xf32> to vector<8x32xf32>
    %28 = vector.broadcast %3 : f32 to vector<8x32xf32>
    %29 = arith.mulf %27, %28 : vector<8x32xf32>
    %30 = arith.addf %25, %29 : vector<8x32xf32>
    %c4_24 = arith.constant 4 : index
    %c0_25 = arith.constant 0 : index
    %c0_26 = arith.constant 0 : index
    %31 = vector.load %arg0[%c4_24, %c0_25, %c0_26] : memref<50x8x32xf32, #tpu.memory_space<vmem>>, vector<1x8x32xf32>
    %32 = vector.shape_cast %31 : vector<1x8x32xf32> to vector<8x32xf32>
    %33 = vector.broadcast %4 : f32 to vector<8x32xf32>
    %34 = arith.mulf %32, %33 : vector<8x32xf32>
    %35 = arith.addf %30, %34 : vector<8x32xf32>
    %c5_27 = arith.constant 5 : index
    %c0_28 = arith.constant 0 : index
    %c0_29 = arith.constant 0 : index
    %36 = vector.load %arg0[%c5_27, %c0_28, %c0_29] : memref<50x8x32xf32, #tpu.memory_space<vmem>>, vector<1x8x32xf32>
    %37 = vector.shape_cast %36 : vector<1x8x32xf32> to vector<8x32xf32>
    %38 = vector.broadcast %5 : f32 to vector<8x32xf32>
    %39 = arith.mulf %37, %38 : vector<8x32xf32>
    %40 = arith.addf %35, %39 : vector<8x32xf32>
    %c6_30 = arith.constant 6 : index
    %c0_31 = arith.constant 0 : index
    %c0_32 = arith.constant 0 : index
    %41 = vector.load %arg0[%c6_30, %c0_31, %c0_32] : memref<50x8x32xf32, #tpu.memory_space<vmem>>, vector<1x8x32xf32>
    %42 = vector.shape_cast %41 : vector<1x8x32xf32> to vector<8x32xf32>
    %43 = vector.broadcast %6 : f32 to vector<8x32xf32>
    %44 = arith.mulf %42, %43 : vector<8x32xf32>
    %45 = arith.addf %40, %44 : vector<8x32xf32>
    %c7_33 = arith.constant 7 : index
    %c0_34 = arith.constant 0 : index
    %c0_35 = arith.constant 0 : index
    %46 = vector.load %arg0[%c7_33, %c0_34, %c0_35] : memref<50x8x32xf32, #tpu.memory_space<vmem>>, vector<1x8x32xf32>
    %47 = vector.shape_cast %46 : vector<1x8x32xf32> to vector<8x32xf32>
    %48 = vector.broadcast %7 : f32 to vector<8x32xf32>
    %49 = arith.mulf %47, %48 : vector<8x32xf32>
    %50 = arith.addf %45, %49 : vector<8x32xf32>
    %c8_36 = arith.constant 8 : index
    %c0_37 = arith.constant 0 : index
    %c0_38 = arith.constant 0 : index
    %51 = vector.load %arg0[%c8_36, %c0_37, %c0_38] : memref<50x8x32xf32, #tpu.memory_space<vmem>>, vector<1x8x32xf32>
    %52 = vector.shape_cast %51 : vector<1x8x32xf32> to vector<8x32xf32>
    %53 = vector.broadcast %8 : f32 to vector<8x32xf32>
    %54 = arith.mulf %52, %53 : vector<8x32xf32>
    %55 = arith.addf %50, %54 : vector<8x32xf32>
    %c9_39 = arith.constant 9 : index
    %c0_40 = arith.constant 0 : index
    %c0_41 = arith.constant 0 : index
    %56 = vector.load %arg0[%c9_39, %c0_40, %c0_41] : memref<50x8x32xf32, #tpu.memory_space<vmem>>, vector<1x8x32xf32>
    %57 = vector.shape_cast %56 : vector<1x8x32xf32> to vector<8x32xf32>
    %58 = vector.broadcast %9 : f32 to vector<8x32xf32>
    %59 = arith.mulf %57, %58 : vector<8x32xf32>
    %60 = arith.addf %55, %59 : vector<8x32xf32>
    %61 = vector.broadcast %10 : f32 to vector<8x32xf32>
    %62 = arith.addf %60, %61 : vector<8x32xf32>
    %cst = arith.constant 0.000000e+00 : f32
    %63 = vector.broadcast %cst : f32 to vector<8x32xf32>
    %64 = arith.maximumf %62, %63 : vector<8x32xf32>
    %c10_42 = arith.constant 10 : index
    %c0_43 = arith.constant 0 : index
    %c0_44 = arith.constant 0 : index
    %65 = vector.load %arg0[%c10_42, %c0_43, %c0_44] : memref<50x8x32xf32, #tpu.memory_space<vmem>>, vector<1x8x32xf32>
    %66 = vector.shape_cast %65 : vector<1x8x32xf32> to vector<8x32xf32>
    %67 = vector.broadcast %0 : f32 to vector<8x32xf32>
    %68 = arith.mulf %66, %67 : vector<8x32xf32>
    %c11_45 = arith.constant 11 : index
    %c0_46 = arith.constant 0 : index
    %c0_47 = arith.constant 0 : index
    %69 = vector.load %arg0[%c11_45, %c0_46, %c0_47] : memref<50x8x32xf32, #tpu.memory_space<vmem>>, vector<1x8x32xf32>
    %70 = vector.shape_cast %69 : vector<1x8x32xf32> to vector<8x32xf32>
    %71 = vector.broadcast %1 : f32 to vector<8x32xf32>
    %72 = arith.mulf %70, %71 : vector<8x32xf32>
    %73 = arith.addf %68, %72 : vector<8x32xf32>
    %c12 = arith.constant 12 : index
    %c0_48 = arith.constant 0 : index
    %c0_49 = arith.constant 0 : index
    %74 = vector.load %arg0[%c12, %c0_48, %c0_49] : memref<50x8x32xf32, #tpu.memory_space<vmem>>, vector<1x8x32xf32>
    %75 = vector.shape_cast %74 : vector<1x8x32xf32> to vector<8x32xf32>
    %76 = vector.broadcast %2 : f32 to vector<8x32xf32>
    %77 = arith.mulf %75, %76 : vector<8x32xf32>
    %78 = arith.addf %73, %77 : vector<8x32xf32>
    %c13 = arith.constant 13 : index
    %c0_50 = arith.constant 0 : index
    %c0_51 = arith.constant 0 : index
    %79 = vector.load %arg0[%c13, %c0_50, %c0_51] : memref<50x8x32xf32, #tpu.memory_space<vmem>>, vector<1x8x32xf32>
    %80 = vector.shape_cast %79 : vector<1x8x32xf32> to vector<8x32xf32>
    %81 = vector.broadcast %3 : f32 to vector<8x32xf32>
    %82 = arith.mulf %80, %81 : vector<8x32xf32>
    %83 = arith.addf %78, %82 : vector<8x32xf32>
    %c14 = arith.constant 14 : index
    %c0_52 = arith.constant 0 : index
    %c0_53 = arith.constant 0 : index
    %84 = vector.load %arg0[%c14, %c0_52, %c0_53] : memref<50x8x32xf32, #tpu.memory_space<vmem>>, vector<1x8x32xf32>
    %85 = vector.shape_cast %84 : vector<1x8x32xf32> to vector<8x32xf32>
    %86 = vector.broadcast %4 : f32 to vector<8x32xf32>
    %87 = arith.mulf %85, %86 : vector<8x32xf32>
    %88 = arith.addf %83, %87 : vector<8x32xf32>
    %c15 = arith.constant 15 : index
    %c0_54 = arith.constant 0 : index
    %c0_55 = arith.constant 0 : index
    %89 = vector.load %arg0[%c15, %c0_54, %c0_55] : memref<50x8x32xf32, #tpu.memory_space<vmem>>, vector<1x8x32xf32>
    %90 = vector.shape_cast %89 : vector<1x8x32xf32> to vector<8x32xf32>
    %91 = vector.broadcast %5 : f32 to vector<8x32xf32>
    %92 = arith.mulf %90, %91 : vector<8x32xf32>
    %93 = arith.addf %88, %92 : vector<8x32xf32>
    %c16 = arith.constant 16 : index
    %c0_56 = arith.constant 0 : index
    %c0_57 = arith.constant 0 : index
    %94 = vector.load %arg0[%c16, %c0_56, %c0_57] : memref<50x8x32xf32, #tpu.memory_space<vmem>>, vector<1x8x32xf32>
    %95 = vector.shape_cast %94 : vector<1x8x32xf32> to vector<8x32xf32>
    %96 = vector.broadcast %6 : f32 to vector<8x32xf32>
    %97 = arith.mulf %95, %96 : vector<8x32xf32>
    %98 = arith.addf %93, %97 : vector<8x32xf32>
    %c17 = arith.constant 17 : index
    %c0_58 = arith.constant 0 : index
    %c0_59 = arith.constant 0 : index
    %99 = vector.load %arg0[%c17, %c0_58, %c0_59] : memref<50x8x32xf32, #tpu.memory_space<vmem>>, vector<1x8x32xf32>
    %100 = vector.shape_cast %99 : vector<1x8x32xf32> to vector<8x32xf32>
    %101 = vector.broadcast %7 : f32 to vector<8x32xf32>
    %102 = arith.mulf %100, %101 : vector<8x32xf32>
    %103 = arith.addf %98, %102 : vector<8x32xf32>
    %c18 = arith.constant 18 : index
    %c0_60 = arith.constant 0 : index
    %c0_61 = arith.constant 0 : index
    %104 = vector.load %arg0[%c18, %c0_60, %c0_61] : memref<50x8x32xf32, #tpu.memory_space<vmem>>, vector<1x8x32xf32>
    %105 = vector.shape_cast %104 : vector<1x8x32xf32> to vector<8x32xf32>
    %106 = vector.broadcast %8 : f32 to vector<8x32xf32>
    %107 = arith.mulf %105, %106 : vector<8x32xf32>
    %108 = arith.addf %103, %107 : vector<8x32xf32>
    %c19 = arith.constant 19 : index
    %c0_62 = arith.constant 0 : index
    %c0_63 = arith.constant 0 : index
    %109 = vector.load %arg0[%c19, %c0_62, %c0_63] : memref<50x8x32xf32, #tpu.memory_space<vmem>>, vector<1x8x32xf32>
    %110 = vector.shape_cast %109 : vector<1x8x32xf32> to vector<8x32xf32>
    %111 = vector.broadcast %9 : f32 to vector<8x32xf32>
    %112 = arith.mulf %110, %111 : vector<8x32xf32>
    %113 = arith.addf %108, %112 : vector<8x32xf32>
    %114 = vector.broadcast %10 : f32 to vector<8x32xf32>
    %115 = arith.addf %113, %114 : vector<8x32xf32>
    %cst_64 = arith.constant 0.000000e+00 : f32
    %116 = vector.broadcast %cst_64 : f32 to vector<8x32xf32>
    %117 = arith.maximumf %115, %116 : vector<8x32xf32>
    %118 = arith.maximumf %64, %117 : vector<8x32xf32>
    %c20 = arith.constant 20 : index
    %c0_65 = arith.constant 0 : index
    %c0_66 = arith.constant 0 : index
    %119 = vector.load %arg0[%c20, %c0_65, %c0_66] : memref<50x8x32xf32, #tpu.memory_space<vmem>>, vector<1x8x32xf32>
    %120 = vector.shape_cast %119 : vector<1x8x32xf32> to vector<8x32xf32>
    %121 = vector.broadcast %0 : f32 to vector<8x32xf32>
    %122 = arith.mulf %120, %121 : vector<8x32xf32>
    %c21 = arith.constant 21 : index
    %c0_67 = arith.constant 0 : index
    %c0_68 = arith.constant 0 : index
    %123 = vector.load %arg0[%c21, %c0_67, %c0_68] : memref<50x8x32xf32, #tpu.memory_space<vmem>>, vector<1x8x32xf32>
    %124 = vector.shape_cast %123 : vector<1x8x32xf32> to vector<8x32xf32>
    %125 = vector.broadcast %1 : f32 to vector<8x32xf32>
    %126 = arith.mulf %124, %125 : vector<8x32xf32>
    %127 = arith.addf %122, %126 : vector<8x32xf32>
    %c22 = arith.constant 22 : index
    %c0_69 = arith.constant 0 : index
    %c0_70 = arith.constant 0 : index
    %128 = vector.load %arg0[%c22, %c0_69, %c0_70] : memref<50x8x32xf32, #tpu.memory_space<vmem>>, vector<1x8x32xf32>
    %129 = vector.shape_cast %128 : vector<1x8x32xf32> to vector<8x32xf32>
    %130 = vector.broadcast %2 : f32 to vector<8x32xf32>
    %131 = arith.mulf %129, %130 : vector<8x32xf32>
    %132 = arith.addf %127, %131 : vector<8x32xf32>
    %c23 = arith.constant 23 : index
    %c0_71 = arith.constant 0 : index
    %c0_72 = arith.constant 0 : index
    %133 = vector.load %arg0[%c23, %c0_71, %c0_72] : memref<50x8x32xf32, #tpu.memory_space<vmem>>, vector<1x8x32xf32>
    %134 = vector.shape_cast %133 : vector<1x8x32xf32> to vector<8x32xf32>
    %135 = vector.broadcast %3 : f32 to vector<8x32xf32>
    %136 = arith.mulf %134, %135 : vector<8x32xf32>
    %137 = arith.addf %132, %136 : vector<8x32xf32>
    %c24 = arith.constant 24 : index
    %c0_73 = arith.constant 0 : index
    %c0_74 = arith.constant 0 : index
    %138 = vector.load %arg0[%c24, %c0_73, %c0_74] : memref<50x8x32xf32, #tpu.memory_space<vmem>>, vector<1x8x32xf32>
    %139 = vector.shape_cast %138 : vector<1x8x32xf32> to vector<8x32xf32>
    %140 = vector.broadcast %4 : f32 to vector<8x32xf32>
    %141 = arith.mulf %139, %140 : vector<8x32xf32>
    %142 = arith.addf %137, %141 : vector<8x32xf32>
    %c25 = arith.constant 25 : index
    %c0_75 = arith.constant 0 : index
    %c0_76 = arith.constant 0 : index
    %143 = vector.load %arg0[%c25, %c0_75, %c0_76] : memref<50x8x32xf32, #tpu.memory_space<vmem>>, vector<1x8x32xf32>
    %144 = vector.shape_cast %143 : vector<1x8x32xf32> to vector<8x32xf32>
    %145 = vector.broadcast %5 : f32 to vector<8x32xf32>
    %146 = arith.mulf %144, %145 : vector<8x32xf32>
    %147 = arith.addf %142, %146 : vector<8x32xf32>
    %c26 = arith.constant 26 : index
    %c0_77 = arith.constant 0 : index
    %c0_78 = arith.constant 0 : index
    %148 = vector.load %arg0[%c26, %c0_77, %c0_78] : memref<50x8x32xf32, #tpu.memory_space<vmem>>, vector<1x8x32xf32>
    %149 = vector.shape_cast %148 : vector<1x8x32xf32> to vector<8x32xf32>
    %150 = vector.broadcast %6 : f32 to vector<8x32xf32>
    %151 = arith.mulf %149, %150 : vector<8x32xf32>
    %152 = arith.addf %147, %151 : vector<8x32xf32>
    %c27 = arith.constant 27 : index
    %c0_79 = arith.constant 0 : index
    %c0_80 = arith.constant 0 : index
    %153 = vector.load %arg0[%c27, %c0_79, %c0_80] : memref<50x8x32xf32, #tpu.memory_space<vmem>>, vector<1x8x32xf32>
    %154 = vector.shape_cast %153 : vector<1x8x32xf32> to vector<8x32xf32>
    %155 = vector.broadcast %7 : f32 to vector<8x32xf32>
    %156 = arith.mulf %154, %155 : vector<8x32xf32>
    %157 = arith.addf %152, %156 : vector<8x32xf32>
    %c28 = arith.constant 28 : index
    %c0_81 = arith.constant 0 : index
    %c0_82 = arith.constant 0 : index
    %158 = vector.load %arg0[%c28, %c0_81, %c0_82] : memref<50x8x32xf32, #tpu.memory_space<vmem>>, vector<1x8x32xf32>
    %159 = vector.shape_cast %158 : vector<1x8x32xf32> to vector<8x32xf32>
    %160 = vector.broadcast %8 : f32 to vector<8x32xf32>
    %161 = arith.mulf %159, %160 : vector<8x32xf32>
    %162 = arith.addf %157, %161 : vector<8x32xf32>
    %c29 = arith.constant 29 : index
    %c0_83 = arith.constant 0 : index
    %c0_84 = arith.constant 0 : index
    %163 = vector.load %arg0[%c29, %c0_83, %c0_84] : memref<50x8x32xf32, #tpu.memory_space<vmem>>, vector<1x8x32xf32>
    %164 = vector.shape_cast %163 : vector<1x8x32xf32> to vector<8x32xf32>
    %165 = vector.broadcast %9 : f32 to vector<8x32xf32>
    %166 = arith.mulf %164, %165 : vector<8x32xf32>
    %167 = arith.addf %162, %166 : vector<8x32xf32>
    %168 = vector.broadcast %10 : f32 to vector<8x32xf32>
    %169 = arith.addf %167, %168 : vector<8x32xf32>
    %cst_85 = arith.constant 0.000000e+00 : f32
    %170 = vector.broadcast %cst_85 : f32 to vector<8x32xf32>
    %171 = arith.maximumf %169, %170 : vector<8x32xf32>
    %172 = arith.maximumf %118, %171 : vector<8x32xf32>
    %c30 = arith.constant 30 : index
    %c0_86 = arith.constant 0 : index
    %c0_87 = arith.constant 0 : index
    %173 = vector.load %arg0[%c30, %c0_86, %c0_87] : memref<50x8x32xf32, #tpu.memory_space<vmem>>, vector<1x8x32xf32>
    %174 = vector.shape_cast %173 : vector<1x8x32xf32> to vector<8x32xf32>
    %175 = vector.broadcast %0 : f32 to vector<8x32xf32>
    %176 = arith.mulf %174, %175 : vector<8x32xf32>
    %c31 = arith.constant 31 : index
    %c0_88 = arith.constant 0 : index
    %c0_89 = arith.constant 0 : index
    %177 = vector.load %arg0[%c31, %c0_88, %c0_89] : memref<50x8x32xf32, #tpu.memory_space<vmem>>, vector<1x8x32xf32>
    %178 = vector.shape_cast %177 : vector<1x8x32xf32> to vector<8x32xf32>
    %179 = vector.broadcast %1 : f32 to vector<8x32xf32>
    %180 = arith.mulf %178, %179 : vector<8x32xf32>
    %181 = arith.addf %176, %180 : vector<8x32xf32>
    %c32 = arith.constant 32 : index
    %c0_90 = arith.constant 0 : index
    %c0_91 = arith.constant 0 : index
    %182 = vector.load %arg0[%c32, %c0_90, %c0_91] : memref<50x8x32xf32, #tpu.memory_space<vmem>>, vector<1x8x32xf32>
    %183 = vector.shape_cast %182 : vector<1x8x32xf32> to vector<8x32xf32>
    %184 = vector.broadcast %2 : f32 to vector<8x32xf32>
    %185 = arith.mulf %183, %184 : vector<8x32xf32>
    %186 = arith.addf %181, %185 : vector<8x32xf32>
    %c33 = arith.constant 33 : index
    %c0_92 = arith.constant 0 : index
    %c0_93 = arith.constant 0 : index
    %187 = vector.load %arg0[%c33, %c0_92, %c0_93] : memref<50x8x32xf32, #tpu.memory_space<vmem>>, vector<1x8x32xf32>
    %188 = vector.shape_cast %187 : vector<1x8x32xf32> to vector<8x32xf32>
    %189 = vector.broadcast %3 : f32 to vector<8x32xf32>
    %190 = arith.mulf %188, %189 : vector<8x32xf32>
    %191 = arith.addf %186, %190 : vector<8x32xf32>
    %c34 = arith.constant 34 : index
    %c0_94 = arith.constant 0 : index
    %c0_95 = arith.constant 0 : index
    %192 = vector.load %arg0[%c34, %c0_94, %c0_95] : memref<50x8x32xf32, #tpu.memory_space<vmem>>, vector<1x8x32xf32>
    %193 = vector.shape_cast %192 : vector<1x8x32xf32> to vector<8x32xf32>
    %194 = vector.broadcast %4 : f32 to vector<8x32xf32>
    %195 = arith.mulf %193, %194 : vector<8x32xf32>
    %196 = arith.addf %191, %195 : vector<8x32xf32>
    %c35 = arith.constant 35 : index
    %c0_96 = arith.constant 0 : index
    %c0_97 = arith.constant 0 : index
    %197 = vector.load %arg0[%c35, %c0_96, %c0_97] : memref<50x8x32xf32, #tpu.memory_space<vmem>>, vector<1x8x32xf32>
    %198 = vector.shape_cast %197 : vector<1x8x32xf32> to vector<8x32xf32>
    %199 = vector.broadcast %5 : f32 to vector<8x32xf32>
    %200 = arith.mulf %198, %199 : vector<8x32xf32>
    %201 = arith.addf %196, %200 : vector<8x32xf32>
    %c36 = arith.constant 36 : index
    %c0_98 = arith.constant 0 : index
    %c0_99 = arith.constant 0 : index
    %202 = vector.load %arg0[%c36, %c0_98, %c0_99] : memref<50x8x32xf32, #tpu.memory_space<vmem>>, vector<1x8x32xf32>
    %203 = vector.shape_cast %202 : vector<1x8x32xf32> to vector<8x32xf32>
    %204 = vector.broadcast %6 : f32 to vector<8x32xf32>
    %205 = arith.mulf %203, %204 : vector<8x32xf32>
    %206 = arith.addf %201, %205 : vector<8x32xf32>
    %c37 = arith.constant 37 : index
    %c0_100 = arith.constant 0 : index
    %c0_101 = arith.constant 0 : index
    %207 = vector.load %arg0[%c37, %c0_100, %c0_101] : memref<50x8x32xf32, #tpu.memory_space<vmem>>, vector<1x8x32xf32>
    %208 = vector.shape_cast %207 : vector<1x8x32xf32> to vector<8x32xf32>
    %209 = vector.broadcast %7 : f32 to vector<8x32xf32>
    %210 = arith.mulf %208, %209 : vector<8x32xf32>
    %211 = arith.addf %206, %210 : vector<8x32xf32>
    %c38 = arith.constant 38 : index
    %c0_102 = arith.constant 0 : index
    %c0_103 = arith.constant 0 : index
    %212 = vector.load %arg0[%c38, %c0_102, %c0_103] : memref<50x8x32xf32, #tpu.memory_space<vmem>>, vector<1x8x32xf32>
    %213 = vector.shape_cast %212 : vector<1x8x32xf32> to vector<8x32xf32>
    %214 = vector.broadcast %8 : f32 to vector<8x32xf32>
    %215 = arith.mulf %213, %214 : vector<8x32xf32>
    %216 = arith.addf %211, %215 : vector<8x32xf32>
    %c39 = arith.constant 39 : index
    %c0_104 = arith.constant 0 : index
    %c0_105 = arith.constant 0 : index
    %217 = vector.load %arg0[%c39, %c0_104, %c0_105] : memref<50x8x32xf32, #tpu.memory_space<vmem>>, vector<1x8x32xf32>
    %218 = vector.shape_cast %217 : vector<1x8x32xf32> to vector<8x32xf32>
    %219 = vector.broadcast %9 : f32 to vector<8x32xf32>
    %220 = arith.mulf %218, %219 : vector<8x32xf32>
    %221 = arith.addf %216, %220 : vector<8x32xf32>
    %222 = vector.broadcast %10 : f32 to vector<8x32xf32>
    %223 = arith.addf %221, %222 : vector<8x32xf32>
    %cst_106 = arith.constant 0.000000e+00 : f32
    %224 = vector.broadcast %cst_106 : f32 to vector<8x32xf32>
    %225 = arith.maximumf %223, %224 : vector<8x32xf32>
    %226 = arith.maximumf %172, %225 : vector<8x32xf32>
    %c40 = arith.constant 40 : index
    %c0_107 = arith.constant 0 : index
    %c0_108 = arith.constant 0 : index
    %227 = vector.load %arg0[%c40, %c0_107, %c0_108] : memref<50x8x32xf32, #tpu.memory_space<vmem>>, vector<1x8x32xf32>
    %228 = vector.shape_cast %227 : vector<1x8x32xf32> to vector<8x32xf32>
    %229 = vector.broadcast %0 : f32 to vector<8x32xf32>
    %230 = arith.mulf %228, %229 : vector<8x32xf32>
    %c41 = arith.constant 41 : index
    %c0_109 = arith.constant 0 : index
    %c0_110 = arith.constant 0 : index
    %231 = vector.load %arg0[%c41, %c0_109, %c0_110] : memref<50x8x32xf32, #tpu.memory_space<vmem>>, vector<1x8x32xf32>
    %232 = vector.shape_cast %231 : vector<1x8x32xf32> to vector<8x32xf32>
    %233 = vector.broadcast %1 : f32 to vector<8x32xf32>
    %234 = arith.mulf %232, %233 : vector<8x32xf32>
    %235 = arith.addf %230, %234 : vector<8x32xf32>
    %c42 = arith.constant 42 : index
    %c0_111 = arith.constant 0 : index
    %c0_112 = arith.constant 0 : index
    %236 = vector.load %arg0[%c42, %c0_111, %c0_112] : memref<50x8x32xf32, #tpu.memory_space<vmem>>, vector<1x8x32xf32>
    %237 = vector.shape_cast %236 : vector<1x8x32xf32> to vector<8x32xf32>
    %238 = vector.broadcast %2 : f32 to vector<8x32xf32>
    %239 = arith.mulf %237, %238 : vector<8x32xf32>
    %240 = arith.addf %235, %239 : vector<8x32xf32>
    %c43 = arith.constant 43 : index
    %c0_113 = arith.constant 0 : index
    %c0_114 = arith.constant 0 : index
    %241 = vector.load %arg0[%c43, %c0_113, %c0_114] : memref<50x8x32xf32, #tpu.memory_space<vmem>>, vector<1x8x32xf32>
    %242 = vector.shape_cast %241 : vector<1x8x32xf32> to vector<8x32xf32>
    %243 = vector.broadcast %3 : f32 to vector<8x32xf32>
    %244 = arith.mulf %242, %243 : vector<8x32xf32>
    %245 = arith.addf %240, %244 : vector<8x32xf32>
    %c44 = arith.constant 44 : index
    %c0_115 = arith.constant 0 : index
    %c0_116 = arith.constant 0 : index
    %246 = vector.load %arg0[%c44, %c0_115, %c0_116] : memref<50x8x32xf32, #tpu.memory_space<vmem>>, vector<1x8x32xf32>
    %247 = vector.shape_cast %246 : vector<1x8x32xf32> to vector<8x32xf32>
    %248 = vector.broadcast %4 : f32 to vector<8x32xf32>
    %249 = arith.mulf %247, %248 : vector<8x32xf32>
    %250 = arith.addf %245, %249 : vector<8x32xf32>
    %c45 = arith.constant 45 : index
    %c0_117 = arith.constant 0 : index
    %c0_118 = arith.constant 0 : index
    %251 = vector.load %arg0[%c45, %c0_117, %c0_118] : memref<50x8x32xf32, #tpu.memory_space<vmem>>, vector<1x8x32xf32>
    %252 = vector.shape_cast %251 : vector<1x8x32xf32> to vector<8x32xf32>
    %253 = vector.broadcast %5 : f32 to vector<8x32xf32>
    %254 = arith.mulf %252, %253 : vector<8x32xf32>
    %255 = arith.addf %250, %254 : vector<8x32xf32>
    %c46 = arith.constant 46 : index
    %c0_119 = arith.constant 0 : index
    %c0_120 = arith.constant 0 : index
    %256 = vector.load %arg0[%c46, %c0_119, %c0_120] : memref<50x8x32xf32, #tpu.memory_space<vmem>>, vector<1x8x32xf32>
    %257 = vector.shape_cast %256 : vector<1x8x32xf32> to vector<8x32xf32>
    %258 = vector.broadcast %6 : f32 to vector<8x32xf32>
    %259 = arith.mulf %257, %258 : vector<8x32xf32>
    %260 = arith.addf %255, %259 : vector<8x32xf32>
    %c47 = arith.constant 47 : index
    %c0_121 = arith.constant 0 : index
    %c0_122 = arith.constant 0 : index
    %261 = vector.load %arg0[%c47, %c0_121, %c0_122] : memref<50x8x32xf32, #tpu.memory_space<vmem>>, vector<1x8x32xf32>
    %262 = vector.shape_cast %261 : vector<1x8x32xf32> to vector<8x32xf32>
    %263 = vector.broadcast %7 : f32 to vector<8x32xf32>
    %264 = arith.mulf %262, %263 : vector<8x32xf32>
    %265 = arith.addf %260, %264 : vector<8x32xf32>
    %c48 = arith.constant 48 : index
    %c0_123 = arith.constant 0 : index
    %c0_124 = arith.constant 0 : index
    %266 = vector.load %arg0[%c48, %c0_123, %c0_124] : memref<50x8x32xf32, #tpu.memory_space<vmem>>, vector<1x8x32xf32>
    %267 = vector.shape_cast %266 : vector<1x8x32xf32> to vector<8x32xf32>
    %268 = vector.broadcast %8 : f32 to vector<8x32xf32>
    %269 = arith.mulf %267, %268 : vector<8x32xf32>
    %270 = arith.addf %265, %269 : vector<8x32xf32>
    %c49 = arith.constant 49 : index
    %c0_125 = arith.constant 0 : index
    %c0_126 = arith.constant 0 : index
    %271 = vector.load %arg0[%c49, %c0_125, %c0_126] : memref<50x8x32xf32, #tpu.memory_space<vmem>>, vector<1x8x32xf32>
    %272 = vector.shape_cast %271 : vector<1x8x32xf32> to vector<8x32xf32>
    %273 = vector.broadcast %9 : f32 to vector<8x32xf32>
    %274 = arith.mulf %272, %273 : vector<8x32xf32>
    %275 = arith.addf %270, %274 : vector<8x32xf32>
    %276 = vector.broadcast %10 : f32 to vector<8x32xf32>
    %277 = arith.addf %275, %276 : vector<8x32xf32>
    %cst_127 = arith.constant 0.000000e+00 : f32
    %278 = vector.broadcast %cst_127 : f32 to vector<8x32xf32>
    %279 = arith.maximumf %277, %278 : vector<8x32xf32>
    %280 = arith.maximumf %226, %279 : vector<8x32xf32>
    %c0_128 = arith.constant 0 : index
    %c0_129 = arith.constant 0 : index
    %281 = vector.load %arg1[%c0_128, %c0_129] : memref<48x384xf32, #tpu.memory_space<vmem>>, vector<32x384xf32>
    %cst_130 = arith.constant dense<0.000000e+00> : vector<8x384xf32>
    %282 = tpu.matmul %280, %281, %cst_130 {dimension_numbers = #tpu.dot_dimension_numbers<[1], [0], [0], [1], [0, 0, 1, 1], [], []>} : vector<8x32xf32>, vector<32x384xf32>, vector<8x384xf32> -> vector<8x384xf32>
    %c32_131 = arith.constant 32 : index
    %c0_132 = arith.constant 0 : index
    %283 = vector.load %arg1[%c32_131, %c0_132] : memref<48x384xf32, #tpu.memory_space<vmem>>, vector<1x384xf32>
    %284 = vector.broadcast %283 : vector<1x384xf32> to vector<8x384xf32>
    %285 = arith.addf %282, %284 : vector<8x384xf32>
    %cst_133 = arith.constant 0.000000e+00 : f32
    %286 = vector.broadcast %cst_133 : f32 to vector<8x384xf32>
    %287 = arith.maximumf %285, %286 : vector<8x384xf32>
    %288 = vector.extract_strided_slice %287 {offsets = [0, 0], sizes = [8, 128], strides = [1, 1]} : vector<8x384xf32> to vector<8x128xf32>
    %289 = vector.extract_strided_slice %287 {offsets = [0, 128], sizes = [8, 128], strides = [1, 1]} : vector<8x384xf32> to vector<8x128xf32>
    %290 = arith.maximumf %288, %289 : vector<8x128xf32>
    %291 = vector.extract_strided_slice %287 {offsets = [0, 256], sizes = [8, 128], strides = [1, 1]} : vector<8x384xf32> to vector<8x128xf32>
    %292 = arith.maximumf %290, %291 : vector<8x128xf32>
    %c33_134 = arith.constant 33 : index
    %c0_135 = arith.constant 0 : index
    %293 = vector.load %arg1[%c33_134, %c0_135] : memref<48x384xf32, #tpu.memory_space<vmem>>, vector<1x128xf32>
    %294 = vector.broadcast %293 : vector<1x128xf32> to vector<8x128xf32>
    %295 = arith.mulf %292, %294 : vector<8x128xf32>
    %cst_136 = arith.constant dense<0.000000e+00> : vector<8xf32>
    %296 = vector.multi_reduction <add>, %295, %cst_136 [1] : vector<8x128xf32> to vector<8xf32>
    %297 = vector.shape_cast %296 : vector<8xf32> to vector<8x1xf32>
    %298 = vector.broadcast %11 : f32 to vector<8x1xf32>
    %299 = arith.addf %297, %298 : vector<8x1xf32>
    %cst_137 = arith.constant 0.000000e+00 : f32
    %300 = vector.broadcast %cst_137 : f32 to vector<8x1xf32>
    %301 = arith.maximumf %299, %300 : vector<8x1xf32>
    %c40_138 = arith.constant 40 : index
    %c0_139 = arith.constant 0 : index
    %302 = vector.load %arg1[%c40_138, %c0_139] : memref<48x384xf32, #tpu.memory_space<vmem>>, vector<8x3xf32>
    %c34_140 = arith.constant 34 : index
    %c0_141 = arith.constant 0 : index
    %303 = vector.load %arg1[%c34_140, %c0_141] : memref<48x384xf32, #tpu.memory_space<vmem>>, vector<1x3xf32>
    %304 = vector.broadcast %301 : vector<8x1xf32> to vector<8x3xf32>
    %305 = arith.mulf %304, %302 : vector<8x3xf32>
    %c0_142 = arith.constant 0 : index
    %c0_143 = arith.constant 0 : index
    %306 = vector.load %arg4[%c0_142, %c0_143] : memref<8x3xf32, #tpu.memory_space<vmem>>, vector<8x3xf32>
    tpu.vector_store %arg4[%c0_142, %c0_143], %305 {strides = array<i32>} : memref<8x3xf32, #tpu.memory_space<vmem>>, vector<8x3xf32>,
    %c0_144 = arith.constant 0 : index
    %c0_145 = arith.constant 0 : index
    %307 = vector.load %arg4[%c0_144, %c0_145] : memref<8x3xf32, #tpu.memory_space<vmem>>, vector<1x3xf32>
    %c1_146 = arith.constant 1 : index
    %c0_147 = arith.constant 0 : index
    %308 = vector.load %arg4[%c1_146, %c0_147] : memref<8x3xf32, #tpu.memory_space<vmem>>, vector<1x3xf32>
    %309 = arith.addf %307, %308 : vector<1x3xf32>
    %c2_148 = arith.constant 2 : index
    %c0_149 = arith.constant 0 : index
    %310 = vector.load %arg4[%c2_148, %c0_149] : memref<8x3xf32, #tpu.memory_space<vmem>>, vector<1x3xf32>
    %311 = arith.addf %309, %310 : vector<1x3xf32>
    %c3_150 = arith.constant 3 : index
    %c0_151 = arith.constant 0 : index
    %312 = vector.load %arg4[%c3_150, %c0_151] : memref<8x3xf32, #tpu.memory_space<vmem>>, vector<1x3xf32>
    %313 = arith.addf %311, %312 : vector<1x3xf32>
    %314 = arith.addf %313, %303 : vector<1x3xf32>
    %cst_152 = arith.constant dense<0xFF800000> : vector<1xf32>
    %315 = vector.multi_reduction <maximumf>, %314, %cst_152 [1] : vector<1x3xf32> to vector<1xf32>
    %316 = vector.shape_cast %315 : vector<1xf32> to vector<1x1xf32>
    %317 = vector.broadcast %316 : vector<1x1xf32> to vector<1x3xf32>
    %318 = arith.subf %314, %317 : vector<1x3xf32>
    %319 = math.exp %318 : vector<1x3xf32>
    %cst_153 = arith.constant dense<0.000000e+00> : vector<1xf32>
    %320 = vector.multi_reduction <add>, %319, %cst_153 [1] : vector<1x3xf32> to vector<1xf32>
    %321 = vector.shape_cast %320 : vector<1xf32> to vector<1x1xf32>
    %322 = tpu.reciprocal %321 {approx = true} : vector<1x1xf32> -> vector<1x1xf32>
    %323 = vector.broadcast %322 : vector<1x1xf32> to vector<1x3xf32>
    %324 = arith.mulf %319, %323 : vector<1x3xf32>
    %c0_154 = arith.constant 0 : index
    %c0_155 = arith.constant 0 : index
    %325 = vector.load %arg3[%c0_154, %c0_155] : memref<2x3xf32, #tpu.memory_space<vmem>>, vector<1x3xf32>
    tpu.vector_store %arg3[%c0_154, %c0_155], %324 {strides = array<i32>} : memref<2x3xf32, #tpu.memory_space<vmem>>, vector<1x3xf32>,
    %c4_156 = arith.constant 4 : index
    %c0_157 = arith.constant 0 : index
    %326 = vector.load %arg4[%c4_156, %c0_157] : memref<8x3xf32, #tpu.memory_space<vmem>>, vector<1x3xf32>
    %c5_158 = arith.constant 5 : index
    %c0_159 = arith.constant 0 : index
    %327 = vector.load %arg4[%c5_158, %c0_159] : memref<8x3xf32, #tpu.memory_space<vmem>>, vector<1x3xf32>
    %328 = arith.addf %326, %327 : vector<1x3xf32>
    %c6_160 = arith.constant 6 : index
    %c0_161 = arith.constant 0 : index
    %329 = vector.load %arg4[%c6_160, %c0_161] : memref<8x3xf32, #tpu.memory_space<vmem>>, vector<1x3xf32>
    %330 = arith.addf %328, %329 : vector<1x3xf32>
    %c7_162 = arith.constant 7 : index
    %c0_163 = arith.constant 0 : index
    %331 = vector.load %arg4[%c7_162, %c0_163] : memref<8x3xf32, #tpu.memory_space<vmem>>, vector<1x3xf32>
    %332 = arith.addf %330, %331 : vector<1x3xf32>
    %333 = arith.addf %332, %303 : vector<1x3xf32>
    %cst_164 = arith.constant dense<0xFF800000> : vector<1xf32>
    %334 = vector.multi_reduction <maximumf>, %333, %cst_164 [1] : vector<1x3xf32> to vector<1xf32>
    %335 = vector.shape_cast %334 : vector<1xf32> to vector<1x1xf32>
    %336 = vector.broadcast %335 : vector<1x1xf32> to vector<1x3xf32>
    %337 = arith.subf %333, %336 : vector<1x3xf32>
    %338 = math.exp %337 : vector<1x3xf32>
    %cst_165 = arith.constant dense<0.000000e+00> : vector<1xf32>
    %339 = vector.multi_reduction <add>, %338, %cst_165 [1] : vector<1x3xf32> to vector<1xf32>
    %340 = vector.shape_cast %339 : vector<1xf32> to vector<1x1xf32>
    %341 = tpu.reciprocal %340 {approx = true} : vector<1x1xf32> -> vector<1x1xf32>
    %342 = vector.broadcast %341 : vector<1x1xf32> to vector<1x3xf32>
    %343 = arith.mulf %338, %342 : vector<1x3xf32>
    %c1_166 = arith.constant 1 : index
    %c0_167 = arith.constant 0 : index
    %344 = vector.load %arg3[%c1_166, %c0_167] : memref<2x3xf32, #tpu.memory_space<vmem>>, vector<1x3xf32>
    tpu.vector_store %arg3[%c1_166, %c0_167], %343 {strides = array<i32>} : memref<2x3xf32, #tpu.memory_space<vmem>>, vector<1x3xf32>,
    return
  }
}

</mosaic_0001>

<bundles_post_ra>
// kernel: time_agg_net_forward.1
= control target key start
LH: loop header
LB: loop body
LE: loop exit
PB: predicated region body
PF: predicated region fallthrough
CT: control target
= control target key end

     0   :  { %8 = vsyncpa [#allocation5], 0  ;;  %s987_s0 = inlined_call_operand.vmem [shape: f32[50,8,32], index: 0, kind: input, shape index: {}]   ;;  %s988_s1 = inlined_call_operand.vmem [shape: f32[48,384], index: 1, kind: input, shape index: {}]   ;;  %s989_s2 = inlined_call_operand.vmem [shape: f32[1,12], index: 2, kind: input, shape index: {}]   ;;  %s990_s3 = inlined_call_operand.hbm [shape: f32[2,3], index: 3, kind: output, shape index: {}]  }
   0x1   :  { %9 = vsyncpa [#allocation4], 0  ;;  %s20_s14 = sshll.u32 %s989_s2, 4  ;;  %s21_s14 = int_to_ptr.vmem [resolvable:$true] %s20_s14 }
   0x2   :  { %s613_s15 = scalar_lea.vmem %s21_s14, 16  ;;  %p618_p1 = scmp.lt.s32.totalorder %s21_s14, %s21_s14 }
   0x3   :  { %p614_p0 = scmp.ne.s32.totalorder %s21_s14, %s613_s15  ;;  %p619_p2 = scmp.lt.s32.totalorder %s613_s15, %s613_s15 }
   0x5   :  { %p620_p3 = por %p619_p2, %p618_p1 }
   0x7   :  { %p621_p4 = pnand %p620_p3, %p614_p0 }
   0x9   :  { %624 = shalt.err (!%p621_p4)
}
   0xa   :  { %s651_s16 = smov [#allocation3]  }
   0xb   :  { %23 = dma.vmem_to_smem %s21_s14, 16, %s651_s16, [#allocation5]  }
   0xc   :  { %647 = dma.done.wait [#allocation5], 16  }
   0xd   :  { %648 = vsyncadd [#allocation5], 4294967280 }
   0xe   :  { %27 = sfence }
   0xf   :  { %v260_v0 = vld [vmem:[%s988_s1 + $0x8] sm:$0xff]  ;;  %v263_v1 = vld [vmem:[%s988_s1 + $0x20] sm:$0xff]  ;;  %v262_v4 = vld [vmem:[%s988_s1 + $0x18] sm:$0xff]  ;;  %v652_v5 = vmov 0.0|0.0   ;;  %v653_v8 = vmov 0.0   ;;  %s28_s28 = sld [smem:[#allocation3]] }
  0x10   :  { %v259_v2 = vld [vmem:[%s988_s1] sm:$0xff]  ;;  %v586_v3 = vpack.c.bf16 %v263_v1, %v260_v0  ;;  %594 = vmatprep.subr.bf16.mxu1 %v652_v5  ;;  %v261_v6 = vld [vmem:[%s988_s1 + $0x10] sm:$0xff]  ;;  %v264_v7 = vld [vmem:[%s988_s1 + $0x28] sm:$0xff]  ;;  %357 = vmatprep.mubr.f32.mxu0 %v653_v8  ;;  %s507_s8 = sld [smem:[#allocation3 + $0x1]]  ;;  %vm654_vm0 = vmmov 0   ;;  %s508_s15 = sld [smem:[#allocation3 + $0x2]] }
  0x11   :  { %v588_v9 = vpack.c.bf16 %v262_v4, %v259_v2  ;;  %v595_v10 = vpack.c.bf16 %v264_v7, %v261_v6  ;;  %v266_v11 = vld [vmem:[%s988_s1 + $0x38] sm:$0xff]  ;;  %v269_v12 = vld [vmem:[%s988_s1 + $0x50] sm:$0xff]  ;;  %583 = vmatprep.mubr.msk.f32.mxu1 %vm654_vm0, %v653_v8  ;;  %v268_v15 = vld [vmem:[%s988_s1 + $0x48] sm:$0xff]  ;;  %s509_s16 = sld [smem:[#allocation3 + $0x3]]  ;;  %s510_s17 = sld [smem:[#allocation3 + $0x4]]  ;;  %vm289_vm1 = vcmask 261120  }
  0x12   :  { %v265_v13 = vld [vmem:[%s988_s1 + $0x30] sm:$0xff]  ;;  %587 = vmatprep.subr.bf16.mxu0 %v586_v3  ;;  %v590_v14 = vpack.c.bf16 %v269_v12, %v266_v11  ;;  %v267_v16 = vld [vmem:[%s988_s1 + $0x40] sm:$0xff]  ;;  %v270_v17 = vld [vmem:[%s988_s1 + $0x58] sm:$0xff]  ;;  %s511_s18 = sld [smem:[#allocation3 + $0x5]]  ;;  %s715_s19 = sld [smem:[#allocation3 + $0x6]]  ;;  %vm449_vm2 = vcmask 23552  }
  0x13   :  { %589 = vmatpush1.bf16.msra.mxu0 %v588_v9  ;;  %596 = vmatpush3.bf16.msra.mxu1 %v595_v10  ;;  %v592_v18 = vpack.c.bf16 %v268_v15, %v265_v13  ;;  %v598_v19 = vpack.c.bf16 %v270_v17, %v267_v16  ;;  %v40_v20 = vld [vmem:[%s987_s0] sm:$0xff]  ;;  %s720_s21 = sld [smem:[#allocation3 + $0x7]]  ;;  %s722_s22 = sld [smem:[#allocation3 + $0x8]]  ;;  %v518_v21 = vld [vmem:[%s987_s0 + $0x8] sm:$0xff]  ;;  %v519_v23 = vld [vmem:[%s987_s0 + $0x10] sm:$0xff]  ;;  %vm459_vm3 = vcmask 16384  }
  0x14   :  { %591 = vmatprep.subr.bf16.mxu0 %v590_v14  ;;  %597 = vmatprep.subr.bf16.mxu1 %v652_v5  ;;  %s732_s27 = sld [smem:[#allocation3 + $0x9]]  ;;  %v520_v26 = vld [vmem:[%s987_s0 + $0x18] sm:$0xff]  ;;  %v527_v27 = vld [vmem:[%s987_s0 + $0x50] sm:$0xff]  ;;  %v521_v34 = vld [vmem:[%s987_s0 + $0x20] sm:$0xff]  ;;  %s759_s9 = sld [smem:[#allocation3 + $0xa]] }
  0x15   :  { %v727_v22 = vstv %s28_s28  ;;  %v528_v31 = vld [vmem:[%s987_s0 + $0x58] sm:$0xff]  ;;  %v529_v39 = vld [vmem:[%s987_s0 + $0x60] sm:$0xff]  ;;  %v522_v40 = vld [vmem:[%s987_s0 + $0x28] sm:$0xff] }
  0x16   :  { %v42_v24 = vmul.f32 %v727_v22, %v40_v20  ;;  %v735_v25 = vstv %s507_s8  ;;  %v744_v29 = vstv %s508_s15  ;;  %v93_v30 = vmul.f32 %v527_v27, %v727_v22  ;;  %v530_v42 = vld [vmem:[%s987_s0 + $0x68] sm:$0xff]  ;;  %v523_v45 = vld [vmem:[%s987_s0 + $0x30] sm:$0xff] }
  0x17   :  { %593 = vmatpush1.bf16.msra.mxu0 %v592_v18  ;;  %599 = vmatpush3.bf16.msra.mxu1 %v598_v19  ;;  %v46_v28 = vmul.f32 %v518_v21, %v735_v25  ;;  %v51_v32 = vmul.f32 %v519_v23, %v744_v29  ;;  %v751_v33 = vstv %s509_s16  ;;  %v756_v35 = vstv %s510_s17  ;;  %v524_v47 = vld [vmem:[%s987_s0 + $0x38] sm:$0xff]  ;;  %v531_v48 = vld [vmem:[%s987_s0 + $0x70] sm:$0xff]  ;;  %s517_s16 = sld [smem:[#allocation3 + $0xb]] }
  0x18   :  { %v96_v36 = vmul.f32 %v528_v31, %v735_v25  ;;  %v56_v38 = vmul.f32 %v520_v26, %v751_v33  ;;  %v768_v41 = vstv %s511_s18  ;;  %v61_v44 = vmul.f32 %v521_v34, %v756_v35  ;;  %v525_v50 = vld [vmem:[%s987_s0 + $0x40] sm:$0xff]  ;;  %v532_v58 = vld [vmem:[%s987_s0 + $0x78] sm:$0xff]  ;;  %v538_v59 = vld [vmem:[%s987_s0 + $0xa8] sm:$0xff] }
  0x19   :  { %v47_v37 = vadd.f32 %v46_v28, %v42_v24  ;;  %v778_v46 = vstv %s715_s19  ;;  %v787_v49 = vstv %s720_s21  ;;  %v793_v51 = vstv %s722_s22  ;;  %v537_v54 = vld [vmem:[%s987_s0 + $0xa0] sm:$0xff] }
  0x1a   :  { %v97_v52 = vadd.f32 %v96_v36, %v93_v30  ;;  %v100_v53 = vmul.f32 %v529_v39, %v744_v29  ;;  %v66_v56 = vmul.f32 %v522_v40, %v768_v41  ;;  %v104_v57 = vmul.f32 %v530_v42, %v751_v33  ;;  %v539_v60 = vld [vmem:[%s987_s0 + $0xb0] sm:$0xff]  ;;  %v526_v62 = vld [vmem:[%s987_s0 + $0x48] sm:$0xff]  ;;  %v533_v2 = vld [vmem:[%s987_s0 + $0x80] sm:$0xff] }
  0x1b   :  { %v52_v43 = vadd.f32 %v51_v32, %v47_v37  ;;  %v71_v61 = vmul.f32 %v523_v45, %v778_v46  ;;  %v815_v63 = vstv %s732_s27  ;;  %v108_v1 = vmul.f32 %v531_v48, %v756_v35  ;;  %v534_v6 = vld [vmem:[%s987_s0 + $0x88] sm:$0xff]  ;;  %v540_v8 = vld [vmem:[%s987_s0 + $0xb8] sm:$0xff]  ;;  %v535_v11 = vld [vmem:[%s987_s0 + $0x90] sm:$0xff] }
  0x1c   :  { %v101_v0 = vadd.f32 %v100_v53, %v97_v52  ;;  %v76_v4 = vmul.f32 %v524_v47, %v787_v49  ;;  %v81_v5 = vmul.f32 %v525_v50, %v793_v51  ;;  %v135_v7 = vmul.f32 %v537_v54, %v727_v22  ;;  %v547_v14 = vld [vmem:[%s987_s0 + $0xf0] sm:$0xff]  ;;  %v548_v15 = vld [vmem:[%s987_s0 + $0xf8] sm:$0xff]  ;;  %v541_v20 = vld [vmem:[%s987_s0 + $0xc0] sm:$0xff] }
  0x1d   :  { %v57_v55 = vadd.f32 %v56_v38, %v52_v43  ;;  %v112_v10 = vmul.f32 %v532_v58, %v768_v41  ;;  %v138_v12 = vmul.f32 %v538_v59, %v735_v25  ;;  %v142_v13 = vmul.f32 %v539_v60, %v744_v29  ;;  %v549_v21 = vld [vmem:[%s987_s0 + $0x100] sm:$0xff]  ;;  %v536_v26 = vld [vmem:[%s987_s0 + $0x98] sm:$0xff]  ;;  %v550_v30 = vld [vmem:[%s987_s0 + $0x108] sm:$0xff] }
  0x1e   :  { %v105_v9 = vadd.f32 %v104_v57, %v101_v0  ;;  %v86_v17 = vmul.f32 %v526_v62, %v815_v63  ;;  %v844_v18 = vstv %s759_s9  ;;  %v116_v19 = vmul.f32 %v533_v2, %v778_v46  ;;  %v542_v34 = vld [vmem:[%s987_s0 + $0xc8] sm:$0xff]  ;;  %v543_v36 = vld [vmem:[%s987_s0 + $0xd0] sm:$0xff]  ;;  %v544_v43 = vld [vmem:[%s987_s0 + $0xd8] sm:$0xff] }
  0x1f   :  { %v62_v3 = vadd.f32 %v61_v44, %v57_v55  ;;  %v120_v24 = vmul.f32 %v534_v6, %v787_v49  ;;  %v139_v27 = vadd.f32 %v138_v12, %v135_v7  ;;  %v146_v28 = vmul.f32 %v540_v8, %v751_v33  ;;  %v551_v45 = vld [vmem:[%s987_s0 + $0x110] sm:$0xff]  ;;  %v557_v53 = vld [vmem:[%s987_s0 + $0x140] sm:$0xff]  ;;  %v558_v54 = vld [vmem:[%s987_s0 + $0x148] sm:$0xff] }
  0x20   :  { %v109_v23 = vadd.f32 %v108_v1, %v105_v9  ;;  %v124_v32 = vmul.f32 %v535_v11, %v793_v51  ;;  %v177_v37 = vmul.f32 %v547_v14, %v727_v22  ;;  %v180_v38 = vmul.f32 %v548_v15, %v735_v25  ;;  %v552_v59 = vld [vmem:[%s987_s0 + $0x118] sm:$0xff]  ;;  %v559_v60 = vld [vmem:[%s987_s0 + $0x150] sm:$0xff]  ;;  %v545_v6 = vld [vmem:[%s987_s0 + $0xe0] sm:$0xff] }
  0x21   :  { %v67_v16 = vadd.f32 %v66_v56, %v62_v3  ;;  %v143_v40 = vadd.f32 %v142_v13, %v139_v27  ;;  %v150_v42 = vmul.f32 %v541_v20, %v756_v35  ;;  %v184_v44 = vmul.f32 %v549_v21, %v744_v29  ;;  %v560_v2 = vld [vmem:[%s987_s0 + $0x158] sm:$0xff]  ;;  %v553_v7 = vld [vmem:[%s987_s0 + $0x120] sm:$0xff] }
  0x22   :  { %v113_v39 = vadd.f32 %v112_v10, %v109_v23  ;;  %v128_v48 = vmul.f32 %v536_v26, %v815_v63  ;;  %v181_v50 = vadd.f32 %v180_v38, %v177_v37  ;;  %v188_v52 = vmul.f32 %v550_v30, %v751_v33  ;;  %v561_v9 = vld [vmem:[%s987_s0 + $0x160] sm:$0xff]  ;;  %v562_v23 = vld [vmem:[%s987_s0 + $0x168] sm:$0xff]  ;;  %v563_v30 = vld [vmem:[%s987_s0 + $0x170] sm:$0xff] }
  0x23   :  { %v72_v31 = vadd.f32 %v71_v61, %v67_v16  ;;  %v147_v56 = vadd.f32 %v146_v28, %v143_v40  ;;  %v154_v57 = vmul.f32 %v542_v34, %v768_v41  ;;  %v158_v58 = vmul.f32 %v543_v36, %v778_v46  ;;  %v546_v16 = vld [vmem:[%s987_s0 + $0xe8] sm:$0xff]  ;;  %v555_v28 = vld [vmem:[%s987_s0 + $0x130] sm:$0xff]  ;;  %v556_v37 = vld [vmem:[%s987_s0 + $0x138] sm:$0xff] }
  0x24   :  { %v117_v55 = vadd.f32 %v116_v19, %v113_v39  ;;  %v162_v62 = vmul.f32 %v544_v43, %v787_v49  ;;  %v185_v0 = vadd.f32 %v184_v44, %v181_v50  ;;  %v192_v1 = vmul.f32 %v551_v45, %v756_v35  ;;  %v564_v44 = vld [vmem:[%s987_s0 + $0x178] sm:$0xff] }
  0x25   :  { %v77_v47 = vadd.f32 %v76_v4, %v72_v31  ;;  %v151_v4 = vadd.f32 %v150_v42, %v147_v56  ;;  %v222_v8 = vmul.f32 %v558_v54, %v735_v25  ;;  %v196_v12 = vmul.f32 %v552_v59, %v768_v41 }
  0x26   :  { %v121_v3 = vadd.f32 %v120_v24, %v117_v55  ;;  %v189_v11 = vadd.f32 %v188_v52, %v185_v0  ;;  %v226_v13 = vmul.f32 %v559_v60, %v744_v29  ;;  %v230_v19 = vmul.f32 %v560_v2, %v751_v33 }
  0x27   :  { %v82_v61 = vadd.f32 %v81_v5, %v77_v47  ;;  %v219_v5 = vmul.f32 %v557_v53, %v727_v22  ;;  %v155_v15 = vadd.f32 %v154_v57, %v151_v4  ;;  %v554_v22 = vld [vmem:[%s987_s0 + $0x128] sm:$0xff]  ;;  %v200_v21 = vmul.f32 %v553_v7, %v778_v46 }
  0x28   :  { %v125_v14 = vadd.f32 %v124_v32, %v121_v3  ;;  %v193_v20 = vadd.f32 %v192_v1, %v189_v11  ;;  %v234_v29 = vmul.f32 %v561_v9, %v756_v35  ;;  %v170_v31 = vmul.f32 %v546_v16, %v815_v63  ;;  %v566_v57 = vld [vmem:[%s987_s0 + $0x188] sm:$0xff] }
  0x29   :  { %v87_v10 = vadd.f32 %v86_v17, %v82_v61  ;;  %v223_v25 = vadd.f32 %v222_v8, %v219_v5  ;;  %v166_v17 = vmul.f32 %v545_v6, %v793_v51  ;;  %v159_v27 = vadd.f32 %v158_v58, %v155_v15 }
  0x2a   :  { %v129_v26 = vadd.f32 %v128_v48, %v125_v14  ;;  %v197_v35 = vadd.f32 %v196_v12, %v193_v20  ;;  %v204_v32 = vmul.f32 %v554_v22, %v787_v49  ;;  %v238_v39 = vmul.f32 %v562_v23, %v768_v41  ;;  %v565_v41 = vld [vmem:[%s987_s0 + $0x180] sm:$0xff] }
  0x2b   :  { %v89_v24 = vadd.f32 %v844_v18, %v87_v10  ;;  %v227_v33 = vadd.f32 %v226_v13, %v223_v25  ;;  %v163_v36 = vadd.f32 %v162_v62, %v159_v27  ;;  %v208_v42 = vmul.f32 %v555_v28, %v793_v51  ;;  %v439_v28 = vld [vmem:[%s988_s1 + $0x61] ss:$0 sm:$0xff] }
  0x2c   :  { %v130_v34 = vadd.f32 %v129_v26, %v844_v18  ;;  %v201_v40 = vadd.f32 %v200_v21, %v197_v35  ;;  %v242_v43 = vmul.f32 %v563_v30, %v778_v46  ;;  %v212_v53 = vmul.f32 %v556_v37, %v815_v63 }
  0x2d   :  { %v231_v38 = vadd.f32 %v230_v19, %v227_v33  ;;  %v90_v45 = vmax.f32 %v89_v24, 0.0  ;;  %v167_v48 = vadd.f32 %v166_v17, %v163_v36  ;;  %v246_v56 = vmul.f32 %v564_v44, %v787_v49 }
  0x2e   :  { %v131_v47 = vmax.f32 %v130_v34, 0.0  ;;  %v205_v52 = vadd.f32 %v204_v32, %v201_v40  ;;  %v250_v61 = vmul.f32 %v565_v41, %v793_v51  ;;  %v254_v2 = vmul.f32 %v566_v57, %v815_v63  ;;  %v567_v63 = vld [vmem:[%s988_s1 + $0x60] ss:$8 sm:$0x7]  ;;  %v446_v34 = vld [vmem:[%s988_s1 + $0x78] sm:$0xff] }
  0x2f   :  { %v235_v50 = vadd.f32 %v234_v29, %v231_v38  ;;  %v171_v54 = vadd.f32 %v170_v31, %v167_v48  ;;  %v274_v51 = vlaneseq  ;;  %v443_v31 = vstv %s517_s16 }
  0x30   :  { %v209_v46 = vadd.f32 %v208_v42, %v205_v52  ;;  %v132_v58 = vmax.f32 %v90_v45, %v131_v47 }
  0x31   :  { %v239_v55 = vadd.f32 %v238_v39, %v235_v50  ;;  %v172_v59 = vadd.f32 %v171_v54, %v844_v18  ;;  %v275_v11 = vshrl.u32 %v274_v51, 7  ;;  %v447_v50 = vld [vmem:[%s988_s1 + $0x62] ss:$0 sm:$0xff]  ;;  %s655_s1 = smov [#allocation6]  }
  0x32   :  { %v213_v62 = vadd.f32 %v212_v53, %v209_v46  ;;  %s498_s18 = sshll.u32 %s655_s1, 4  ;;  %s499_s18 = int_to_ptr.vmem [resolvable:$true] %s498_s18 }
  0x33   :  { %v243_v60 = vadd.f32 %v242_v43, %v239_v55  ;;  %v173_v0 = vmax.f32 %v172_v59, 0.0  ;;  %v276_v12 = vsub.s32 0, %v275_v11  ;;  %v284_v13 = vsub.s32 2, %v275_v11  ;;  %s625_s24 = scalar_lea.vmem %s499_s18, 32  ;;  %p630_p6 = scmp.lt.s32.totalorder %s499_s18, %s499_s18 }
  0x34   :  { %v214_v3 = vadd.f32 %v213_v62, %v844_v18  ;;  %v280_v14 = vsub.s32 1, %v275_v11  ;;  %p626_p5 = scmp.ne.s32.totalorder %s499_s18, %s625_s24  ;;  %p631_p7 = scmp.lt.s32.totalorder %s625_s24, %s625_s24 }
  0x35   :  { %v247_v1 = vadd.f32 %v246_v56, %v243_v60  ;;  %v174_v4 = vmax.f32 %v132_v58, %v173_v0  ;;  %v277_v15 = vrot.slane %v567_v63, %v276_v12  ;;  %v285_v16 = vrot.slane %v567_v63, %v284_v13 }
  0x36   :  { %v215_v6 = vmax.f32 %v214_v3, 0.0  ;;  %v281_v22 = vrot.slane %v567_v63, %v280_v14  ;;  %p632_p8 = por %p631_p7, %p630_p6 }
  0x37   :  { %v251_v49 = vadd.f32 %v250_v61, %v247_v1 }
  0x38   :  { %v216_v5 = vmax.f32 %v174_v4, %v215_v6  ;;  %p633_p9 = pnand %p632_p8, %p626_p5 }
  0x39   :  { %v255_v7 = vadd.f32 %v254_v2, %v251_v49 }
  0x3b   :  { %v256_v8 = vadd.f32 %v255_v7, %v844_v18 }
  0x3d   :  { %v257_v9 = vmax.f32 %v256_v8, 0.0 }
  0x3f   :  { %v258_v10 = vmax.f32 %v216_v5, %v257_v9 }
  0x41   :  { %568 = vmatmul.mubr.msk.f32.vlgmr.msra.gmra.mrb[0].mxu0 %vm289_vm1, %v258_v10  ;;  %584 = vmatmul.mubr.msk.f32.vlgmr.msra.gmra.mrb[0].mxu1 %vm289_vm1, %v258_v10 }
 0x114   :  { %v359_v25 = vpop.f32.mrb[0].mxu0  ;;  %v430_v19 = vpop.f32.mrb[0].mxu1 }
 0x115   :  { %v360_v18 = vadd.f32 %v359_v25, %v277_v15  ;;  %v361_v17 = vpop.f32.mrb[1].mxu0  ;;  %v431_v20 = vadd.f32 %v430_v19, %v285_v16  ;;  %v585_v21 = vpop.f32.mrb[1].mxu1 }
 0x116   :  { %v362_v29 = vadd.f32 %v361_v17, %v281_v22 }
 0x117   :  { %v434_v23 = vmax.f32 %v360_v18, 0.0  ;;  %v436_v26 = vmax.f32 %v431_v20, 0.0 }
 0x118   :  { %v435_v24 = vmax.f32 %v362_v29, 0.0 }
 0x11a   :  { %v437_v27 = vmax.f32 %v434_v23, %v435_v24 }
 0x11c   :  { %v438_v33 = vmax.f32 %v437_v27, %v436_v26 }
 0x11e   :  { %v440_v30 = vmul.f32 %v439_v28, %v438_v33 }
 0x120   :  { %441 = vadd.xlane.f32.xlu0 %v440_v30 }
 0x1ad   :  { %v442_v35 = vpop.xlane.xlu0 %441 }
 0x1ae   :  { %v444_v32 = vadd.f32 %v443_v31, %v442_v35 }
 0x1b0   :  { %v445_v36 = vmax.f32 %v444_v32, 0.0 }
 0x1b2   :  { %v448_v37 = vmul.f32 %v446_v34, %v445_v36 }
 0x1b4   :  { %450 = vst.msk [vmem:[#allocation2] sm:$0xff] %vm449_vm2, %v448_v37 }
 0x1bb   :  { %v472_v38 = vld [vmem:[#allocation2 + $0x4] sm:$0x1]  ;;  %v473_v39 = vld [vmem:[#allocation2 + $0x5] sm:$0x1]  ;;  %v451_v42 = vld [vmem:[#allocation2] sm:$0x1] }
 0x1bc   :  { %v474_v40 = vadd.f32 %v473_v39, %v472_v38  ;;  %v452_v43 = vld [vmem:[#allocation2 + $0x1] sm:$0x1]  ;;  %v475_v44 = vld [vmem:[#allocation2 + $0x6] sm:$0x1]  ;;  %v454_v48 = vld [vmem:[#allocation2 + $0x2] sm:$0x1] }
 0x1bd   :  { %v453_v45 = vadd.f32 %v452_v43, %v451_v42  ;;  %v477_v52 = vld [vmem:[#allocation2 + $0x7] sm:$0x1]  ;;  %v456_v54 = vld [vmem:[#allocation2 + $0x3] sm:$0x1] }
 0x1be   :  { %v476_v47 = vadd.f32 %v475_v44, %v474_v40 }
 0x1bf   :  { %v455_v53 = vadd.f32 %v454_v48, %v453_v45 }
 0x1c0   :  { %v478_v41 = vadd.f32 %v477_v52, %v476_v47 }
 0x1c1   :  { %v457_v55 = vadd.f32 %v456_v54, %v455_v53 }
 0x1c2   :  { %v479_v56 = vadd.f32 %v478_v41, %v447_v50 }
 0x1c3   :  { %v458_v46 = vadd.f32 %v457_v55, %v447_v50 }
 0x1c4   :  { %v480_v57 = vsel %vm459_vm3, %v479_v56, -inf }
 0x1c5   :  { %481 = vmax.xlane.f32.xlu1 %v480_v57  ;;  %v460_v58 = vsel %vm459_vm3, %v458_v46, -inf }
 0x1c6   :  { %461 = vmax.xlane.f32.xlu0 %v460_v58 }
 0x252   :  { %v482_v59 = vpop.xlane.xlu1 %481 }
 0x253   :  { %v483_v60 = vsub.f32 %v479_v56, %v482_v59  ;;  %v462_v61 = vpop.xlane.xlu0 %461 }
 0x254   :  { %v463_v62 = vsub.f32 %v458_v46, %v462_v61 }
 0x255   :  { %v484_v0 = vmul.f32 1.442695, %v483_v60 }
 0x256   :  { %v464_v1 = vmul.f32 1.442695, %v463_v62 }
 0x257   :  { %605 = vpow2.f32 %v484_v0 }
 0x258   :  { %607 = vpow2.f32 %v464_v1 }
 0x261   :  { %v606_v2 = vpop.eup %605 }
 0x262   :  { %v608_v3 = vpop.eup %607  ;;  %v486_v4 = vsel %vm459_vm3, %v606_v2, 0.0 }
 0x263   :  { %487 = vadd.xlane.f32.xlu0 %v486_v4  ;;  %v466_v49 = vsel %vm459_vm3, %v608_v3, 0.0 }
 0x264   :  { %467 = vadd.xlane.f32.xlu1 %v466_v49 }
 0x2f0   :  { %v488_v6 = vpop.xlane.xlu0 %487 }
 0x2f1   :  { %v468_v7 = vpop.xlane.xlu1 %467  ;;  %609 = vrcp.f32 %v488_v6 }
 0x2f2   :  { %611 = vrcp.f32 %v468_v7 }
 0x2fb   :  { %v610_v5 = vpop.eup %609 }
 0x2fc   :  { %v612_v8 = vpop.eup %611  ;;  %v490_v9 = vmul.f32 %v610_v5, %v606_v2 }
 0x2fd   :  { %v470_v10 = vmul.f32 %v612_v8, %v608_v3 }
 0x2fe   :  { %491 = vst.msk [vmem:[#allocation6 + $0x1] sm:$0x1] %vm459_vm3, %v490_v9 }
 0x2ff   :  { %471 = vst.msk [vmem:[#allocation6] sm:$0x1] %vm459_vm3, %v470_v10 }
 0x300   :  { %636 = shalt.err (!%p633_p9)
}
 0x301   :  { %s637_s9 = scalar_lea.hbm %s990_s3, 32 }
 0x302   :  { %p638_p10 = scmp.ne.s32.totalorder %s990_s3, %s637_s9  ;;  %p641_p11 = scmp.lt.u32.totalorder %s637_s9, %s990_s3 }
 0x304   :  { %p643_p12 = pnand %p641_p11, %p638_p10 }
 0x306   :  { %646 = shalt.err (!%p643_p12)
}
 0x307   :  { %501 = dma.vmem_to_hbm [thread:$0]  %s499_s18, 32, %s990_s3, [#allocation4]  }
 0x308   :  { %649 = dma.done.wait [#allocation4], 32  }
 0x309   :  { %650 = vsyncadd [#allocation4], 4294967264 }
 0x30a   :  { %505 = vsyncpa [#allocation4], 1 }
 0x30b   :  { %506 = vsyncpa [#allocation5], 1 }

</bundles_post_ra>
